<compile_context>
chip_gen: v5e
topology: v5e:2x2
jax: 0.10.0
libtpu: 0.0.40
codegen_flags: <defaults>
</compile_context>

<pallas_src>
import functools

import jax
import jax.numpy as jnp
from jax.experimental import pallas as pl
from jax.experimental.pallas import tpu as pltpu


def _round_up(n, m):
    return (n + m - 1) // m * m


def _unet_block_kernel(x_ref, w_in_ref, b_in_ref, w_mid_ref, b_mid_ref,
                       w_out_ref, b_out_ref, o_ref, *, slope):
    """Whole UNet_block forward for one batch tile, entirely in VMEM / on the MXU."""
    if slope >= 0:
        # LeakyReLU preserves sign for slope >= 0, so LeakyReLU(LeakyReLU(v)) == slope^2 branch.
        neg = slope * slope

        def act2(v):
            return jnp.where(v >= 0, v, neg * v)
    else:  # literal double application for exotic negative slopes

        def act2(v):
            v = jnp.where(v >= 0, v, slope * v)
            return jnp.where(v >= 0, v, slope * v)

    mxu_dtype = w_in_ref.dtype                   # bf16 (or f32) MXU input dtype
    x = x_ref[...].astype(jnp.float32)           # residual + elementwise math stay f32

    # in_block: Linear + LeakyReLU, then the outer activation (fused).
    h = jnp.dot(x.astype(mxu_dtype), w_in_ref[...],
                preferred_element_type=jnp.float32)
    h = act2(h + b_in_ref[...])

    # middle_block (another dense + LeakyReLU), then the outer activation (fused).
    h = jnp.dot(h.astype(mxu_dtype), w_mid_ref[...],
                preferred_element_type=jnp.float32)
    h = act2(h + b_mid_ref[...])

    # out_block: Linear + LeakyReLU, then the outer activation (fused).
    h = jnp.dot(h.astype(mxu_dtype), w_out_ref[...],
                preferred_element_type=jnp.float32)
    h = act2(h + b_out_ref[...])

    # residual
    o_ref[...] = (h + x).astype(o_ref.dtype)


def unet_block_forward(x, params, *, slope, block_b=256):
    """x: [B, D] float32.  params: transposed weights [D_in, D_out] (bf16/f32) + biases [1, D] (f32)."""
    B, D = x.shape
    Dp = _round_up(D, 128)                       # lane-dense feature dim

    # Effective batch tile: sublane-aligned, no bigger than the (padded) batch; when the batch
    # is large enough keep >= 2 grid steps so both v7x TensorCores get work.
    bb = _round_up(min(block_b, _round_up(B, 8)), 8)
    if B > 256 and pl.cdiv(B, bb) < 2:
        bb = _round_up(pl.cdiv(B, 2), 8)
    Bp = _round_up(B, bb)
    grid = (Bp // bb,)

    def pad2(a, rows, cols):
        pr, pc = rows - a.shape[0], cols - a.shape[1]
        return jnp.pad(a, ((0, pr), (0, pc))) if (pr or pc) else a

    xp = pad2(x, Bp, Dp)
    w_in, b_in = pad2(params["w_in"], Dp, Dp), pad2(params["b_in"], 1, Dp)
    w_mid, b_mid = pad2(params["w_mid"], Dp, Dp), pad2(params["b_mid"], 1, Dp)
    w_out, b_out = pad2(params["w_out"], Dp, Dp), pad2(params["b_out"], 1, Dp)

    w_item = jnp.dtype(w_in.dtype).itemsize
    # Grid-invariant weights/biases gain nothing from double-buffering; drop to a single buffer
    # once they are big enough for VMEM pressure to matter (v7x: 64 MiB physical).
    weights_big = (2 * 3 * Dp * Dp * w_item) > (16 << 20)
    wb_mode = pl.Buffered(1) if weights_big else None
    wb_bufs = 1 if weights_big else 2

    x_spec = pl.BlockSpec((bb, Dp), lambda i: (i, 0))
    w_spec = pl.BlockSpec((Dp, Dp), lambda i: (0, 0), pipeline_mode=wb_mode)
    b_spec = pl.BlockSpec((1, Dp), lambda i: (0, 0), pipeline_mode=wb_mode)
    o_spec = pl.BlockSpec((bb, Dp), lambda i: (i, 0))

    # VMEM budget: weights/biases (single or double buffered) + pipelined in/out activation tiles.
    needed = wb_bufs * (3 * Dp * Dp * w_item + 3 * Dp * 4) + 2 * 2 * bb * Dp * 4
    vmem_limit = int(min(max(needed + (8 << 20), 32 << 20), 64 << 20))

    cost = pl.CostEstimate(
        flops=2 * 3 * Bp * Dp * Dp,
        transcendentals=0,
        bytes_accessed=int(xp.nbytes + Bp * Dp * x.dtype.itemsize
                           + 3 * Dp * Dp * w_item + 3 * Dp * 4),
    )

    kernel = functools.partial(_unet_block_kernel, slope=slope)
    out = pl.pallas_call(
        kernel,
        out_shape=jax.ShapeDtypeStruct((Bp, Dp), x.dtype),
        grid_spec=pltpu.PrefetchScalarGridSpec(
            num_scalar_prefetch=0,
            grid=grid,
            in_specs=[x_spec,
                      w_spec, b_spec,    # in_block
                      w_spec, b_spec,    # middle_block
                      w_spec, b_spec],   # out_block
            out_specs=o_spec,
        ),
        compiler_params=pltpu.CompilerParams(
            dimension_semantics=("parallel",),
            vmem_limit_bytes=vmem_limit),
        cost_estimate=cost,
    )(xp, w_in, b_in, w_mid, b_mid, w_out, b_out)

    return out[:B, :D]


def init_params(key, latent_dim, *, w_dtype=jnp.bfloat16):
    """PyTorch-Linear-style uniform(-1/sqrt(D), 1/sqrt(D)) init.

    Weights are stored already transposed ([D_in, D_out]) so the kernel computes x @ W,
    in bf16 by default (native MXU input dtype). Biases stay f32, shaped [1, D].
    """
    bound = 1.0 / float(latent_dim) ** 0.5
    keys = jax.random.split(key, 6)

    def u(k, shape, dtype):
        return jax.random.uniform(k, shape, jnp.float32, -bound, bound).astype(dtype)

    return {
        "w_in":  u(keys[0], (latent_dim, latent_dim), w_dtype),
        "b_in":  u(keys[1], (1, latent_dim), jnp.float32),
        "w_mid": u(keys[2], (latent_dim, latent_dim), w_dtype),
        "b_mid": u(keys[3], (1, latent_dim), jnp.float32),
        "w_out": u(keys[4], (latent_dim, latent_dim), w_dtype),
        "b_out": u(keys[5], (1, latent_dim), jnp.float32),
    }


def unet_block_ref(x, params, slope):
    """Pure-JAX reference of the PyTorch forward, using the same bf16-in / f32-accumulate
    matmul numerics as the kernel (double LeakyReLU kept literal)."""
    def leaky(v):
        return jnp.where(v >= 0, v, slope * v)

    def layer(h, w, b):
        y = jnp.dot(h.astype(w.dtype), w, preferred_element_type=jnp.float32) + b
        return leaky(leaky(y))

    h = layer(x, params["w_in"], params["b_in"])
    h = layer(h, params["w_mid"], params["b_mid"])
    h = layer(h, params["w_out"], params["b_out"])
    return h + x


if __name__ == "__main__":
    latent_dim = 32
    batch = 8
    slope = 0.2

    key = jax.random.PRNGKey(0)
    pkey, xkey = jax.random.split(key)

    params = init_params(pkey, latent_dim)                     # bf16 weights, f32 biases
    x = jax.random.normal(xkey, (batch, latent_dim), jnp.float32)

    out = unet_block_forward(x, params, slope=slope)
    out = jax.block_until_ready(out)

    ref = unet_block_ref(x, params, slope)
    assert out.shape == (batch, latent_dim)
    assert jnp.allclose(out, ref, atol=1e-3, rtol=1e-3), "mismatch vs reference"

    print("KERNEL_OK")
</pallas_src>

<mosaic_0001>
module attributes {stable_mosaic.version = 11 : i64} {
  func.func @_unet_block_kernel(%arg0: i32, %arg1: memref<8x128xf32, #tpu.memory_space<vmem>>, %arg2: memref<128x128xbf16, #tpu.memory_space<vmem>>, %arg3: memref<1x128xf32, #tpu.memory_space<vmem>>, %arg4: memref<128x128xbf16, #tpu.memory_space<vmem>>, %arg5: memref<1x128xf32, #tpu.memory_space<vmem>>, %arg6: memref<128x128xbf16, #tpu.memory_space<vmem>>, %arg7: memref<1x128xf32, #tpu.memory_space<vmem>>, %arg8: memref<8x128xf32, #tpu.memory_space<vmem>>) attributes {dimension_semantics = [#tpu.dimension_semantics<parallel>], iteration_bounds = array<i64: 1>, scalar_prefetch = 0 : i64, scratch_operands = 0 : i64, tpu.core_type = #tpu.core_type<tc>, window_params = [{transform_indices = @transform_0, window_bounds = array<i64: 8, 128>}, {pipeline_mode = #tpu.pipeline_mode<synchronous>, transform_indices = @transform_1, window_bounds = array<i64: 128, 128>}, {pipeline_mode = #tpu.pipeline_mode<synchronous>, transform_indices = @transform_2, window_bounds = array<i64: 1, 128>}, {pipeline_mode = #tpu.pipeline_mode<synchronous>, transform_indices = @transform_3, window_bounds = array<i64: 128, 128>}, {pipeline_mode = #tpu.pipeline_mode<synchronous>, transform_indices = @transform_4, window_bounds = array<i64: 1, 128>}, {pipeline_mode = #tpu.pipeline_mode<synchronous>, transform_indices = @transform_5, window_bounds = array<i64: 128, 128>}, {pipeline_mode = #tpu.pipeline_mode<synchronous>, transform_indices = @transform_6, window_bounds = array<i64: 1, 128>}, {transform_indices = @transform_7, window_bounds = array<i64: 8, 128>}]} {
    %c0 = arith.constant 0 : index
    %c0_0 = arith.constant 0 : index
    %0 = vector.load %arg1[%c0, %c0_0] : memref<8x128xf32, #tpu.memory_space<vmem>>, vector<8x128xf32>
    %1 = arith.truncf %0 : vector<8x128xf32> to vector<8x128xbf16>
    %c0_1 = arith.constant 0 : index
    %c0_2 = arith.constant 0 : index
    %2 = vector.load %arg2[%c0_1, %c0_2] : memref<128x128xbf16, #tpu.memory_space<vmem>>, vector<128x128xbf16>
    %cst = arith.constant dense<0.000000e+00> : vector<8x128xf32>
    %3 = tpu.matmul %1, %2, %cst {dimension_numbers = #tpu.dot_dimension_numbers<[1], [0], [0], [1], [0, 0, 1, 1], [], []>} : vector<8x128xbf16>, vector<128x128xbf16>, vector<8x128xf32> -> vector<8x128xf32>
    %c0_3 = arith.constant 0 : index
    %c0_4 = arith.constant 0 : index
    %4 = vector.load %arg3[%c0_3, %c0_4] : memref<1x128xf32, #tpu.memory_space<vmem>>, vector<1x128xf32>
    %5 = vector.broadcast %4 : vector<1x128xf32> to vector<8x128xf32>
    %6 = arith.addf %3, %5 : vector<8x128xf32>
    %cst_5 = arith.constant 0.000000e+00 : f32
    %7 = vector.broadcast %cst_5 : f32 to vector<8x128xf32>
    %8 = arith.cmpf oge, %6, %7 : vector<8x128xf32>
    %cst_6 = arith.constant 4.000000e-02 : f32
    %9 = vector.broadcast %cst_6 : f32 to vector<8x128xf32>
    %10 = arith.mulf %9, %6 : vector<8x128xf32>
    %11 = arith.select %8, %6, %10 : vector<8x128xi1>, vector<8x128xf32>
    %12 = arith.truncf %11 : vector<8x128xf32> to vector<8x128xbf16>
    %c0_7 = arith.constant 0 : index
    %c0_8 = arith.constant 0 : index
    %13 = vector.load %arg4[%c0_7, %c0_8] : memref<128x128xbf16, #tpu.memory_space<vmem>>, vector<128x128xbf16>
    %cst_9 = arith.constant dense<0.000000e+00> : vector<8x128xf32>
    %14 = tpu.matmul %12, %13, %cst_9 {dimension_numbers = #tpu.dot_dimension_numbers<[1], [0], [0], [1], [0, 0, 1, 1], [], []>} : vector<8x128xbf16>, vector<128x128xbf16>, vector<8x128xf32> -> vector<8x128xf32>
    %c0_10 = arith.constant 0 : index
    %c0_11 = arith.constant 0 : index
    %15 = vector.load %arg5[%c0_10, %c0_11] : memref<1x128xf32, #tpu.memory_space<vmem>>, vector<1x128xf32>
    %16 = vector.broadcast %15 : vector<1x128xf32> to vector<8x128xf32>
    %17 = arith.addf %14, %16 : vector<8x128xf32>
    %cst_12 = arith.constant 0.000000e+00 : f32
    %18 = vector.broadcast %cst_12 : f32 to vector<8x128xf32>
    %19 = arith.cmpf oge, %17, %18 : vector<8x128xf32>
    %cst_13 = arith.constant 4.000000e-02 : f32
    %20 = vector.broadcast %cst_13 : f32 to vector<8x128xf32>
    %21 = arith.mulf %20, %17 : vector<8x128xf32>
    %22 = arith.select %19, %17, %21 : vector<8x128xi1>, vector<8x128xf32>
    %23 = arith.truncf %22 : vector<8x128xf32> to vector<8x128xbf16>
    %c0_14 = arith.constant 0 : index
    %c0_15 = arith.constant 0 : index
    %24 = vector.load %arg6[%c0_14, %c0_15] : memref<128x128xbf16, #tpu.memory_space<vmem>>, vector<128x128xbf16>
    %cst_16 = arith.constant dense<0.000000e+00> : vector<8x128xf32>
    %25 = tpu.matmul %23, %24, %cst_16 {dimension_numbers = #tpu.dot_dimension_numbers<[1], [0], [0], [1], [0, 0, 1, 1], [], []>} : vector<8x128xbf16>, vector<128x128xbf16>, vector<8x128xf32> -> vector<8x128xf32>
    %c0_17 = arith.constant 0 : index
    %c0_18 = arith.constant 0 : index
    %26 = vector.load %arg7[%c0_17, %c0_18] : memref<1x128xf32, #tpu.memory_space<vmem>>, vector<1x128xf32>
    %27 = vector.broadcast %26 : vector<1x128xf32> to vector<8x128xf32>
    %28 = arith.addf %25, %27 : vector<8x128xf32>
    %cst_19 = arith.constant 0.000000e+00 : f32
    %29 = vector.broadcast %cst_19 : f32 to vector<8x128xf32>
    %30 = arith.cmpf oge, %28, %29 : vector<8x128xf32>
    %cst_20 = arith.constant 4.000000e-02 : f32
    %31 = vector.broadcast %cst_20 : f32 to vector<8x128xf32>
    %32 = arith.mulf %31, %28 : vector<8x128xf32>
    %33 = arith.select %30, %28, %32 : vector<8x128xi1>, vector<8x128xf32>
    %34 = arith.addf %33, %0 : vector<8x128xf32>
    %c0_21 = arith.constant 0 : index
    %c0_22 = arith.constant 0 : index
    %35 = vector.load %arg8[%c0_21, %c0_22] : memref<8x128xf32, #tpu.memory_space<vmem>>, vector<8x128xf32>
    tpu.vector_store %arg8[%c0_21, %c0_22], %34 {strides = array<i32>} : memref<8x128xf32, #tpu.memory_space<vmem>>, vector<8x128xf32>,
    return
  }
  func.func @transform_0(%arg0: i32) -> (i32, i32) {
    %c0_i32 = arith.constant 0 : i32
    %c0_i32_0 = arith.constant 0 : i32
    return %arg0, %c0_i32 : i32, i32
  }
  func.func @transform_1(%arg0: i32) -> (i32, i32) {
    %c0_i32 = arith.constant 0 : i32
    %c0_i32_0 = arith.constant 0 : i32
    %c0_i32_1 = arith.constant 0 : i32
    return %c0_i32, %c0_i32_0 : i32, i32
  }
  func.func @transform_2(%arg0: i32) -> (i32, i32) {
    %c0_i32 = arith.constant 0 : i32
    %c0_i32_0 = arith.constant 0 : i32
    %c0_i32_1 = arith.constant 0 : i32
    return %c0_i32, %c0_i32_0 : i32, i32
  }
  func.func @transform_3(%arg0: i32) -> (i32, i32) {
    %c0_i32 = arith.constant 0 : i32
    %c0_i32_0 = arith.constant 0 : i32
    %c0_i32_1 = arith.constant 0 : i32
    return %c0_i32, %c0_i32_0 : i32, i32
  }
  func.func @transform_4(%arg0: i32) -> (i32, i32) {
    %c0_i32 = arith.constant 0 : i32
    %c0_i32_0 = arith.constant 0 : i32
    %c0_i32_1 = arith.constant 0 : i32
    return %c0_i32, %c0_i32_0 : i32, i32
  }
  func.func @transform_5(%arg0: i32) -> (i32, i32) {
    %c0_i32 = arith.constant 0 : i32
    %c0_i32_0 = arith.constant 0 : i32
    %c0_i32_1 = arith.constant 0 : i32
    return %c0_i32, %c0_i32_0 : i32, i32
  }
  func.func @transform_6(%arg0: i32) -> (i32, i32) {
    %c0_i32 = arith.constant 0 : i32
    %c0_i32_0 = arith.constant 0 : i32
    %c0_i32_1 = arith.constant 0 : i32
    return %c0_i32, %c0_i32_0 : i32, i32
  }
  func.func @transform_7(%arg0: i32) -> (i32, i32) {
    %c0_i32 = arith.constant 0 : i32
    %c0_i32_0 = arith.constant 0 : i32
    return %arg0, %c0_i32 : i32, i32
  }
}

</mosaic_0001>

<bundles_post_ra>
// kernel: tpu_custom_call.1
= control target key start
LH: loop header
LB: loop body
LE: loop exit
PB: predicated region body
PF: predicated region fallthrough
CT: control target
= control target key end

     0   :  { %12 = vsyncpa [#allocation3], 0  ;;  %s694_s0 = inlined_call_operand.hbm [shape: f32[8,128], index: 0, kind: input, shape index: {}]   ;;  %s695_s1 = inlined_call_operand.hbm [shape: bf16[128,128], index: 1, kind: input, shape index: {}]   ;;  %s696_s2 = inlined_call_operand.vmem [shape: f32[1,128], index: 2, kind: input, shape index: {}]   ;;  %s697_s3 = inlined_call_operand.hbm [shape: bf16[128,128], index: 3, kind: input, shape index: {}]   ;;  %s698_s4 = inlined_call_operand.vmem [shape: f32[1,128], index: 4, kind: input, shape index: {}]   ;;  %s699_s5 = inlined_call_operand.hbm [shape: bf16[128,128], index: 5, kind: input, shape index: {}]   ;;  %s700_s6 = inlined_call_operand.vmem [shape: f32[1,128], index: 6, kind: input, shape index: {}]   ;;  %s701_s7 = inlined_call_operand.hbm [shape: f32[8,128], index: 7, kind: output, shape index: {}]  }
   0x1   :  { %13 = vsyncpa [#allocation6], 0 }
   0x2   :  { %14 = vsyncpa [#allocation9], 0  ;;  %s31_s26 = sshll.u32 %s695_s1, 4  ;;  %s32_s26 = int_to_ptr.hbm [resolvable:$true] %s31_s26 }
   0x3   :  { %15 = vsyncpa [#allocation4], 0  ;;  %s623_s27 = smov [#allocation5]   ;;  %s21_s8 = sshll.u32 %s694_s0, 4  ;;  %s22_s8 = int_to_ptr.hbm [resolvable:$true] %s21_s8 }
   0x4   :  { %s33_s28 = sshll.u32 %s623_s27, 4  ;;  %s624_s9 = smov 64   ;;  %s34_s28 = int_to_ptr.vmem [resolvable:$true] %s33_s28 }
   0x5   :  { %s625_s10 = smov 4   ;;  %s626_s11 = smov [#allocation2]  }
   0x6   :  { %39 = dma.hbm_to_vmem [thread:$0]  %s32_s26, 1024, %s34_s28, [#allocation6], %s624_s9, %s624_s9, %s625_s10  }
   0x7   :  { %s23_s12 = sshll.u32 %s626_s11, 4  ;;  %s46_s15 = sshll.u32 %s697_s3, 4  ;;  %s24_s12 = int_to_ptr.vmem [resolvable:$true] %s23_s12  ;;  %s47_s15 = int_to_ptr.hbm [resolvable:$true] %s46_s15 }
   0x8   :  { %26 = dma.hbm_to_vmem [thread:$0]  %s22_s8, 128, %s24_s12, [#allocation3]  }
   0x9   :  { %s61_s17 = sshll.u32 %s699_s5, 4  ;;  %s627_s18 = smov [#allocation7]   ;;  %s62_s17 = int_to_ptr.hbm [resolvable:$true] %s61_s17 }
   0xa   :  { %s48_s19 = sshll.u32 %s627_s18, 4  ;;  %s628_s0 = smov [#allocation8]   ;;  %s49_s19 = int_to_ptr.vmem [resolvable:$true] %s48_s19 }
   0xb   :  { %54 = dma.hbm_to_vmem [thread:$0]  %s47_s15, 1024, %s49_s19, [#allocation6], %s624_s9, %s624_s9, %s625_s10  }
   0xc   :  { %s63_s20 = sshll.u32 %s628_s0, 4  ;;  %s64_s20 = int_to_ptr.vmem [resolvable:$true] %s63_s20 }
   0xd   :  { %69 = dma.hbm_to_vmem [thread:$0]  %s62_s17, 1024, %s64_s20, [#allocation9], %s624_s9, %s624_s9, %s625_s10  }
   0xe   :  { %615 = dma.done.wait [#allocation3], 128  }
   0xf   :  { %616 = vsyncadd [#allocation3], 4294967168 }
  0x10   :  { %617 = dma.done.wait [#allocation6], 2048  }
  0x11   :  { %618 = vsyncadd [#allocation6], 4294965248 }
  0x12   :  { %619 = dma.done.wait [#allocation9], 1024  }
  0x13   :  { %620 = vsyncadd [#allocation9], 4294966272  ;;  %v468_v0 = vld [vmem:[#allocation5 + $0x38] sm:$0xff]  ;;  %v467_v1 = vld [vmem:[#allocation5 + $0x30] sm:$0xff]  ;;  %s629_s24 = smov [#allocation10]   ;;  %s353_s27 = sshll.u32 %s701_s7, 4  ;;  %s354_s27 = int_to_ptr.hbm [resolvable:$true] %s353_s27 }
  0x14   :  { %158 = vmatpush.bf16.msra.mxu0 %v468_v0  ;;  %v476_v2 = vld [vmem:[#allocation7 + $0x38] sm:$0xff]  ;;  %v475_v3 = vld [vmem:[#allocation7 + $0x30] sm:$0xff]  ;;  %v466_v4 = vld [vmem:[#allocation5 + $0x28] sm:$0xff]  ;;  %s351_s25 = sshll.u32 %s629_s24, 4  ;;  %s352_s25 = int_to_ptr.vmem [resolvable:$true] %s351_s25 }
  0x15   :  { %243 = vmatpush.bf16.msra.mxu1 %v476_v2  ;;  %v474_v5 = vld [vmem:[#allocation7 + $0x28] sm:$0xff]  ;;  %v465_v6 = vld [vmem:[#allocation5 + $0x20] sm:$0xff]  ;;  %v464_v8 = vld [vmem:[#allocation5 + $0x18] sm:$0xff] }
  0x16   :  { %v473_v7 = vld [vmem:[#allocation7 + $0x20] sm:$0xff]  ;;  %v472_v9 = vld [vmem:[#allocation7 + $0x18] sm:$0xff]  ;;  %v463_v10 = vld [vmem:[#allocation5 + $0x10] sm:$0xff] }
  0x17   :  { %v471_v11 = vld [vmem:[#allocation7 + $0x10] sm:$0xff]  ;;  %v462_v12 = vld [vmem:[#allocation5 + $0x8] sm:$0xff]  ;;  %v461_v13 = vld [vmem:[#allocation5] sm:$0xff] }
  0x18   :  { %159 = vmatpush.bf16.msra.mxu0 %v467_v1  ;;  %v88_v14 = vld [vmem:[#allocation2] sm:$0xff]  ;;  %v470_v16 = vld [vmem:[#allocation7 + $0x8] sm:$0xff]  ;;  %v469_v17 = vld [vmem:[#allocation7] sm:$0xff] }
  0x19   :  { %244 = vmatpush.bf16.msra.mxu1 %v475_v3  ;;  %v89_v15 = vpack.c.bf16 %v88_v14, %v88_v14  ;;  %v484_v18 = vld [vmem:[#allocation8 + $0x38] sm:$0xff]  ;;  %v483_v19 = vld [vmem:[#allocation8 + $0x30] sm:$0xff]  ;;  %v482_v20 = vld [vmem:[#allocation8 + $0x28] sm:$0xff] }
  0x1a   :  { %328 = vmatpush.bf16.msra.mxu2 %v484_v18  ;;  %v481_v21 = vld [vmem:[#allocation8 + $0x20] sm:$0xff]  ;;  %v480_v22 = vld [vmem:[#allocation8 + $0x18] sm:$0xff]  ;;  %v479_v23 = vld [vmem:[#allocation8 + $0x10] sm:$0xff] }
  0x1b   :  { %v492_v24 = vld [vmem:[%s696_s2] ss:$0 sm:$0xff]  ;;  %v478_v31 = vld [vmem:[#allocation8 + $0x8] sm:$0xff]  ;;  %v477_v32 = vld [vmem:[#allocation8] sm:$0xff] }
  0x1c   :  { %160 = vmatpush.bf16.msra.mxu0 %v466_v4  ;;  %v493_v33 = vld [vmem:[%s698_s4] ss:$0 sm:$0xff] }
  0x1d   :  { %245 = vmatpush.bf16.msra.mxu1 %v474_v5  ;;  %v494_v40 = vld [vmem:[%s700_s6] ss:$0 sm:$0xff] }
  0x1e   :  { %329 = vmatpush.bf16.msra.mxu2 %v483_v19 }
  0x20   :  { %161 = vmatpush.bf16.msra.mxu0 %v465_v6 }
  0x21   :  { %246 = vmatpush.bf16.msra.mxu1 %v473_v7 }
  0x22   :  { %330 = vmatpush.bf16.msra.mxu2 %v482_v20 }
  0x24   :  { %162 = vmatpush.bf16.msra.mxu0 %v464_v8 }
  0x25   :  { %247 = vmatpush.bf16.msra.mxu1 %v472_v9 }
  0x26   :  { %331 = vmatpush.bf16.msra.mxu2 %v481_v21 }
  0x28   :  { %163 = vmatpush.bf16.msra.mxu0 %v463_v10 }
  0x29   :  { %248 = vmatpush.bf16.msra.mxu1 %v471_v11 }
  0x2a   :  { %332 = vmatpush.bf16.msra.mxu2 %v480_v22 }
  0x2c   :  { %164 = vmatpush.bf16.msra.mxu0 %v462_v12 }
  0x2d   :  { %249 = vmatpush.bf16.msra.mxu1 %v470_v16 }
  0x2e   :  { %333 = vmatpush.bf16.msra.mxu2 %v479_v23 }
  0x30   :  { %165 = vmatpush.bf16.msra.mxu0 %v461_v13 }
  0x31   :  { %250 = vmatpush.bf16.msra.mxu1 %v469_v17 }
  0x32   :  { %334 = vmatpush.bf16.msra.mxu2 %v478_v31 }
  0x33   :  { %166 = vmatmul.bf16.vlgmr.msra.gmra.mxu0 %v89_v15 }
  0x36   :  { %335 = vmatpush.bf16.msra.mxu2 %v477_v32 }
  0xb0   :  { %v167_v25 = vpop.f32.mrf.mxu0 }
  0xb1   :  { %v168_v26 = vadd.f32 %v492_v24, %v167_v25 }
  0xb3   :  { %v172_v27 = vmul.f32 0.04, %v168_v26  ;;  %vm171_vm0 = vcmp.ge.f32.partialorder %v168_v26, 0.0 }
  0xb5   :  { %v173_v28 = vsel %vm171_vm0, %v168_v26, %v172_v27 }
  0xb6   :  { %v174_v29 = vpack.c.bf16 %v173_v28, %v173_v28 }
  0xb8   :  { %v169_v30 = vpop.f32.mrf.mxu0  ;;  %251 = vmatmul.bf16.vlgmr.msra.gmra.mxu1 %v174_v29 }
 0x135   :  { %v252_v34 = vpop.f32.mrf.mxu1 }
 0x136   :  { %v253_v35 = vadd.f32 %v493_v33, %v252_v34 }
 0x138   :  { %v257_v36 = vmul.f32 0.04, %v253_v35  ;;  %vm256_vm1 = vcmp.ge.f32.partialorder %v253_v35, 0.0 }
 0x13a   :  { %v258_v37 = vsel %vm256_vm1, %v253_v35, %v257_v36 }
 0x13b   :  { %v259_v38 = vpack.c.bf16 %v258_v37, %v258_v37 }
 0x13d   :  { %v254_v39 = vpop.f32.mrf.mxu1  ;;  %336 = vmatmul.bf16.vlgmr.msra.gmra.mxu2 %v259_v38 }
 0x1c0   :  { %v337_v41 = vpop.f32.mrf.mxu2 }
 0x1c1   :  { %v338_v42 = vadd.f32 %v494_v40, %v337_v41 }
 0x1c3   :  { %vm341_vm2 = vcmp.ge.f32.partialorder %v338_v42, 0.0  ;;  %v342_v43 = vmul.f32 0.04, %v338_v42 }
 0x1c5   :  { %v343_v44 = vsel %vm341_vm2, %v338_v42, %v342_v43 }
 0x1c6   :  { %v344_v45 = vadd.f32 %v343_v44, %v88_v14 }
 0x1c8   :  { %v339_v46 = vpop.f32.mrf.mxu2  ;;  %345 = vst [vmem:[#allocation10] sm:$0xff] %v344_v45 }
 0x1c9   :  { %356 = dma.vmem_to_hbm [thread:$0]  %s352_s25, 128, %s354_s27, [#allocation4]  }
 0x1ca   :  { %621 = dma.done.wait [#allocation4], 128  }
 0x1cb   :  { %622 = vsyncadd [#allocation4], 4294967168 }
 0x1cc   :  { %361 = vsyncpa [#allocation3], 1 }
 0x1cd   :  { %362 = vsyncpa [#allocation6], 1 }
 0x1ce   :  { %363 = vsyncpa [#allocation9], 1 }
 0x1cf   :  { %364 = vsyncpa [#allocation4], 1 }

</bundles_post_ra>
